<compile_context>
chip_gen: v6e
topology: v6e:2x2x1
jax: 0.10.0
libtpu: 0.0.40
codegen_flags: <defaults>
</compile_context>

<pallas_src>
import functools

import jax
import jax.numpy as jnp
from jax.experimental import pallas as pl
from jax.experimental.pallas import tpu as pltpu

STATE_DIM = 4      # CartPole-v1 observation dim
HIDDEN_DIM = 128
ACTION_DIM = 2     # CartPole-v1 action dim
LANE = 128         # TPU vreg lane width


def actor_kernel(xT_ref, w1T_ref, b1_ref, wdiff_ref, bdiff_ref, p0_ref):
    # xT:    [STATE_DIM, TILE_B]
    # w1T:   [HIDDEN, STATE_DIM]
    # b1:    [HIDDEN, 1]
    # wdiff: [1, HIDDEN]      = W2[:, 0] - W2[:, 1]
    # bdiff: [1, 1] (SMEM)    = b2[0] - b2[1]
    # p0:    [1, TILE_B]      = softmax(logits)[:, 0]
    hT = jnp.dot(w1T_ref[...], xT_ref[...], preferred_element_type=jnp.float32)
    hT = jnp.maximum(hT + b1_ref[...], 0.0)                       # [HIDDEN, TILE_B]

    # Logit difference d = l0 - l1 (layer-2 bias folded in as an SMEM scalar).
    d = jnp.dot(wdiff_ref[...], hT, preferred_element_type=jnp.float32)
    d = d + bdiff_ref[0, 0]                                       # [1, TILE_B]

    # Numerically-stable 2-class softmax: p0 = sigmoid(d).
    e = jnp.exp(-jnp.abs(d))          # EUP; |.| keeps exp bounded
    inv = 1.0 / (1.0 + e)
    p0 = jnp.where(d >= 0.0, inv, e * inv)
    p0_ref[...] = p0.astype(p0_ref.dtype)                         # single lane-dense store

    # TODO(synk): for per-step RL inference, fuse Gumbel-max / categorical action
    # sampling here (pltpu.prng_seed + pltpu.prng_random_bits) and emit int32
    # actions + log-probs to avoid a separate sampling launch per environment step.


def prepare_actor_params(w1, b1, w2, b2):
    """One-time weight preprocessing, hoisted out of the per-call hot path."""
    w1T = jnp.asarray(w1, jnp.float32).T                              # [H, S]
    b1c = jnp.asarray(b1, jnp.float32).reshape(HIDDEN_DIM, 1)         # [H, 1]
    w2f = jnp.asarray(w2, jnp.float32)
    b2f = jnp.asarray(b2, jnp.float32).reshape(-1)
    w_diff = (w2f[:, 0] - w2f[:, 1]).reshape(1, HIDDEN_DIM)           # [1, H]
    b_diff = (b2f[0] - b2f[1]).reshape(1, 1)                          # [1, 1] SMEM scalar
    return w1T, b1c, w_diff, b_diff


@functools.partial(jax.jit, static_argnames=("tile_b", "use_bf16_matmul"))
def actor_forward(x, w1T, b1c, w_diff, b_diff, *, tile_b=8192, use_bf16_matmul=False):
    """x: [B, STATE_DIM]; preprocessed params from prepare_actor_params -> probs [B, 2]."""
    B = x.shape[0]

    # --- static, lane-aligned tile / padding math -------------------------------
    b_pad = max(LANE, -(-B // LANE) * LANE)              # pad batch to lane multiple
    tile_b = max(LANE, (int(tile_b) // LANE) * LANE)     # force tile to lane multiple
    tile_b = min(tile_b, b_pad)
    if b_pad >= 2 * LANE:
        # Ensure >= 2 grid steps so v7x megacore can shard the batch over both TCs.
        tile_b = min(tile_b, max(LANE, (b_pad // 2 // LANE) * LANE))
    b_pad = -(-b_pad // tile_b) * tile_b
    num_tiles = b_pad // tile_b

    # bf16 only for the MXU operands of the first matmul (v6e/v7x); accumulation
    # and all elementwise work stay f32 (v5e has no bf16 VPU/EUP path).
    in_dtype = jnp.bfloat16 if use_bf16_matmul else jnp.float32

    # Transposed input, zero-padded along the (lane) batch axis.
    xT = jnp.zeros((STATE_DIM, b_pad), in_dtype)
    xT = xT.at[:, :B].set(x.T.astype(in_dtype))
    w1T_k = w1T.astype(in_dtype)

    p0_row = pl.pallas_call(
        actor_kernel,
        out_shape=jax.ShapeDtypeStruct((1, b_pad), jnp.float32),
        grid=(num_tiles,),
        in_specs=[
            pl.BlockSpec((STATE_DIM, tile_b), lambda i: (0, i)),        # x tile (lane-dense)
            pl.BlockSpec((HIDDEN_DIM, STATE_DIM), lambda i: (0, 0)),    # VMEM-resident
            pl.BlockSpec((HIDDEN_DIM, 1), lambda i: (0, 0)),            # VMEM-resident
            pl.BlockSpec((1, HIDDEN_DIM), lambda i: (0, 0)),            # VMEM-resident
            pl.BlockSpec(memory_space=pltpu.MemorySpace.SMEM),          # scalar bias diff
        ],
        out_specs=pl.BlockSpec((1, tile_b), lambda i: (0, i)),
        compiler_params=pltpu.CompilerParams(
            dimension_semantics=("parallel",),   # megacore batch sharding on v7x
        ),
    )(xT, w1T_k, b1c, w_diff, b_diff)

    p0 = p0_row[0, :B]
    return jnp.stack([p0, 1.0 - p0], axis=-1)


def init_params(key):
    # Mimics PyTorch nn.Linear default init: U(-1/sqrt(fan_in), 1/sqrt(fan_in)).
    k1, k2, k3, k4 = jax.random.split(key, 4)
    bound1 = 1.0 / jnp.sqrt(STATE_DIM)
    bound2 = 1.0 / jnp.sqrt(HIDDEN_DIM)
    w1 = jax.random.uniform(k1, (STATE_DIM, HIDDEN_DIM), jnp.float32, -bound1, bound1)
    b1 = jax.random.uniform(k2, (1, HIDDEN_DIM), jnp.float32, -bound1, bound1)
    w2 = jax.random.uniform(k3, (HIDDEN_DIM, ACTION_DIM), jnp.float32, -bound2, bound2)
    b2 = jax.random.uniform(k4, (1, ACTION_DIM), jnp.float32, -bound2, bound2)
    return w1, b1, w2, b2


if __name__ == "__main__":
    key = jax.random.PRNGKey(0)
    k_params, k_x = jax.random.split(key)
    w1, b1, w2, b2 = init_params(k_params)
    prepped = prepare_actor_params(w1, b1, w2, b2)

    def reference(x):
        h = jnp.maximum(x @ w1 + b1, 0.0)
        return jax.nn.softmax(h @ w2 + b2, axis=-1)

    # Small per-step batch (single 128-lane tile) and a multi-tile batch that
    # exercises the pipelined, parallel batch grid (tile clamps to 128 -> 3 steps).
    for B in (8, 384):
        x = jax.random.normal(jax.random.fold_in(k_x, B), (B, STATE_DIM), jnp.float32)
        probs = jax.block_until_ready(actor_forward(x, *prepped))
        probs_ref = reference(x)
        assert probs.shape == (B, ACTION_DIM)
        assert jnp.allclose(probs, probs_ref, atol=1e-5), "mismatch vs reference"
        assert jnp.allclose(jnp.sum(probs, axis=-1), 1.0, atol=1e-5)

    print("KERNEL_OK")
</pallas_src>

<mosaic_0001>
module attributes {stable_mosaic.version = 11 : i64} {
  func.func @actor_kernel(%arg0: i32, %arg1: memref<4x128xf32, #tpu.memory_space<vmem>>, %arg2: memref<128x4xf32, #tpu.memory_space<vmem>>, %arg3: memref<128x1xf32, #tpu.memory_space<vmem>>, %arg4: memref<1x128xf32, #tpu.memory_space<vmem>>, %arg5: memref<1x1xf32, #tpu.memory_space<smem>>, %arg6: memref<1x128xf32, #tpu.memory_space<vmem>>) attributes {dimension_semantics = [#tpu.dimension_semantics<parallel>], iteration_bounds = array<i64: 1>, scalar_prefetch = 0 : i64, scratch_operands = 0 : i64, tpu.core_type = #tpu.core_type<tc>, window_params = [{transform_indices = @transform_0, window_bounds = array<i64: 4, 128>}, {pipeline_mode = #tpu.pipeline_mode<synchronous>, transform_indices = @transform_1, window_bounds = array<i64: 128, 4>}, {pipeline_mode = #tpu.pipeline_mode<synchronous>, transform_indices = @transform_2, window_bounds = array<i64: 128, 1>}, {pipeline_mode = #tpu.pipeline_mode<synchronous>, transform_indices = @transform_3, window_bounds = array<i64: 1, 128>}, {transform_indices = @transform_4, window_bounds = array<i64: 1, 1>}, {transform_indices = @transform_5, window_bounds = array<i64: 1, 128>}]} {
    %c0 = arith.constant 0 : index
    %c0_0 = arith.constant 0 : index
    %0 = vector.load %arg2[%c0, %c0_0] : memref<128x4xf32, #tpu.memory_space<vmem>>, vector<128x4xf32>
    %c0_1 = arith.constant 0 : index
    %c0_2 = arith.constant 0 : index
    %1 = vector.load %arg1[%c0_1, %c0_2] : memref<4x128xf32, #tpu.memory_space<vmem>>, vector<4x128xf32>
    %cst = arith.constant dense<0.000000e+00> : vector<128x128xf32>
    %2 = tpu.matmul %0, %1, %cst {dimension_numbers = #tpu.dot_dimension_numbers<[1], [0], [0], [1], [0, 0, 1, 1], [], []>} : vector<128x4xf32>, vector<4x128xf32>, vector<128x128xf32> -> vector<128x128xf32>
    %c0_3 = arith.constant 0 : index
    %c0_4 = arith.constant 0 : index
    %3 = vector.load %arg3[%c0_3, %c0_4] : memref<128x1xf32, #tpu.memory_space<vmem>>, vector<128x1xf32>
    %4 = vector.broadcast %3 : vector<128x1xf32> to vector<128x128xf32>
    %5 = arith.addf %2, %4 : vector<128x128xf32>
    %cst_5 = arith.constant 0.000000e+00 : f32
    %6 = vector.broadcast %cst_5 : f32 to vector<128x128xf32>
    %7 = arith.maximumf %5, %6 : vector<128x128xf32>
    %c0_6 = arith.constant 0 : index
    %c0_7 = arith.constant 0 : index
    %8 = vector.load %arg4[%c0_6, %c0_7] : memref<1x128xf32, #tpu.memory_space<vmem>>, vector<1x128xf32>
    %cst_8 = arith.constant dense<0.000000e+00> : vector<1x128xf32>
    %9 = tpu.matmul %8, %7, %cst_8 {dimension_numbers = #tpu.dot_dimension_numbers<[1], [0], [0], [1], [0, 0, 1, 1], [], []>} : vector<1x128xf32>, vector<128x128xf32>, vector<1x128xf32> -> vector<1x128xf32>
    %c0_9 = arith.constant 0 : index
    %c0_10 = arith.constant 0 : index
    %10 = memref.load %arg5[%c0_9, %c0_10] : memref<1x1xf32, #tpu.memory_space<smem>>
    %11 = vector.broadcast %10 : f32 to vector<1x128xf32>
    %12 = arith.addf %9, %11 : vector<1x128xf32>
    %13 = math.absf %12 : vector<1x128xf32>
    %cst_11 = arith.constant 0.000000e+00 : f32
    %14 = vector.broadcast %cst_11 : f32 to vector<1x128xf32>
    %15 = arith.subf %14, %13 : vector<1x128xf32>
    %16 = math.exp %15 : vector<1x128xf32>
    %cst_12 = arith.constant 1.000000e+00 : f32
    %17 = vector.broadcast %cst_12 : f32 to vector<1x128xf32>
    %18 = arith.addf %17, %16 : vector<1x128xf32>
    %cst_13 = arith.constant 1.000000e+00 : f32
    %19 = vector.broadcast %cst_13 : f32 to vector<1x128xf32>
    %20 = arith.divf %19, %18 : vector<1x128xf32>
    %cst_14 = arith.constant 0.000000e+00 : f32
    %21 = vector.broadcast %cst_14 : f32 to vector<1x128xf32>
    %22 = arith.cmpf oge, %12, %21 : vector<1x128xf32>
    %23 = arith.mulf %16, %20 : vector<1x128xf32>
    %24 = arith.select %22, %20, %23 : vector<1x128xi1>, vector<1x128xf32>
    %c0_15 = arith.constant 0 : index
    %c0_16 = arith.constant 0 : index
    %25 = vector.load %arg6[%c0_15, %c0_16] : memref<1x128xf32, #tpu.memory_space<vmem>>, vector<1x128xf32>
    tpu.vector_store %arg6[%c0_15, %c0_16], %24 {strides = array<i32>} : memref<1x128xf32, #tpu.memory_space<vmem>>, vector<1x128xf32>,
    return
  }
  func.func @transform_0(%arg0: i32) -> (i32, i32) {
    %c0_i32 = arith.constant 0 : i32
    %c0_i32_0 = arith.constant 0 : i32
    return %c0_i32, %arg0 : i32, i32
  }
  func.func @transform_1(%arg0: i32) -> (i32, i32) {
    %c0_i32 = arith.constant 0 : i32
    %c0_i32_0 = arith.constant 0 : i32
    %c0_i32_1 = arith.constant 0 : i32
    return %c0_i32, %c0_i32_0 : i32, i32
  }
  func.func @transform_2(%arg0: i32) -> (i32, i32) {
    %c0_i32 = arith.constant 0 : i32
    %c0_i32_0 = arith.constant 0 : i32
    %c0_i32_1 = arith.constant 0 : i32
    return %c0_i32, %c0_i32_0 : i32, i32
  }
  func.func @transform_3(%arg0: i32) -> (i32, i32) {
    %c0_i32 = arith.constant 0 : i32
    %c0_i32_0 = arith.constant 0 : i32
    %c0_i32_1 = arith.constant 0 : i32
    return %c0_i32, %c0_i32_0 : i32, i32
  }
  func.func @transform_4(%arg0: i32) -> (i32, i32) {
    %c0_i32 = arith.constant 0 : i32
    %c0_i32_0 = arith.constant 0 : i32
    %c0_i32_1 = arith.constant 0 : i32
    return %c0_i32, %c0_i32_0 : i32, i32
  }
  func.func @transform_5(%arg0: i32) -> (i32, i32) {
    %c0_i32 = arith.constant 0 : i32
    %c0_i32_0 = arith.constant 0 : i32
    return %c0_i32, %arg0 : i32, i32
  }
}

</mosaic_0001>

<bundles_post_ra>
// kernel: actor_forward.1
= control target key start
LH: loop header
LB: loop body
LE: loop exit
PB: predicated region body
PF: predicated region fallthrough
CT: control target
= control target key end

     0   :  { %vm183_vm0 = vcmask 1043456   ;;  %vm134_vm1 = vcmask 31744   ;;  %v557_v3 = vmov 0   ;;  %v558_v34 = vmov 0.0   ;;  %s743_s0 = inlined_call_operand.vmem [shape: f32[4,128], index: 0, kind: input, shape index: {}]   ;;  %s744_s1 = inlined_call_operand.vmem [shape: f32[128,4], index: 1, kind: input, shape index: {}]   ;;  %s745_s2 = inlined_call_operand.vmem [shape: f32[128,1], index: 2, kind: input, shape index: {}]   ;;  %s746_s3 = inlined_call_operand.vmem [shape: f32[1,128], index: 3, kind: input, shape index: {}]   ;;  %s747_s4 = inlined_call_operand.<no memory space> [shape: f32[1,1], index: 4, kind: input, shape index: {}]   ;;  %s748_s5 = inlined_call_operand.vmem [shape: f32[1,128], index: 5, kind: output, shape index: {}]  }
   0x1   :  { %v37_v0 = vld [vmem:[%s743_s0] sm:$0xf]  ;;  %v22_v2 = vld [vmem:[%s744_s1 + $0x8] sm:$0xff]  ;;  %551 = vset.pattern.permute.xlu0 %v557_v3  ;;  %552 = vset.pattern.permute.xlu1 %v557_v3  ;;  %v23_v4 = vld [vmem:[%s744_s1 + $0x10] sm:$0xff]  ;;  %vm559_vm2 = vmmov 0  }
   0x2   :  { %v21_v1 = vld [vmem:[%s744_s1] sm:$0xff]  ;;  %487 = vmatprep.subr.msk.mxu0 %vm183_vm0, %v37_v0  ;;  %v24_v5 = vld [vmem:[%s744_s1 + $0x18] sm:$0xff]  ;;  %v51_v8 = vld [vmem:[%s745_s2 + $0x68] sm:$0xff]  ;;  %513 = vmatprep.subr.mxu1 %v558_v34 }
   0x3   :  { %489 = vmatprep.mubr.msk.f32.mxu0 %vm134_vm1, %v21_v1  ;;  %488 = vmatpush3.msk.msra.mxu0 %vm183_vm0, %v37_v0  ;;  %v25_v6 = vld [vmem:[%s744_s1 + $0x20] sm:$0xff]  ;;  %v53_v7 = vld [vmem:[%s745_s2 + $0x78] sm:$0xff]  ;;  %v52_v9 = vld [vmem:[%s745_s2 + $0x70] sm:$0xff] }
   0x4   :  { %490 = vmatmul.mubr.msk.f32.vlgmr.msra.gmra.mxu0 %vm134_vm1, %v22_v2  ;;  %131 = vperm.xlu0 %551, %v53_v7   ;;  %v26_v10 = vld [vmem:[%s744_s1 + $0x28] sm:$0xff]  ;;  %v50_v11 = vld [vmem:[%s745_s2 + $0x60] sm:$0xff]  ;;  %v27_v12 = vld [vmem:[%s744_s1 + $0x30] sm:$0xff] }
   0x5   :  { %492 = vmatprep.mubr.msk.f32.mxu0 %vm134_vm1, %v23_v4  ;;  %121 = vperm.xlu1 %552, %v51_v8   ;;  %v49_v13 = vld [vmem:[%s745_s2 + $0x58] sm:$0xff]  ;;  %v48_v15 = vld [vmem:[%s745_s2 + $0x50] sm:$0xff]  ;;  %v29_v16 = vld [vmem:[%s744_s1 + $0x40] sm:$0xff] }
   0x6   :  { %v28_v14 = vld [vmem:[%s744_s1 + $0x38] sm:$0xff]  ;;  %v47_v17 = vld [vmem:[%s745_s2 + $0x48] sm:$0xff]  ;;  %v46_v19 = vld [vmem:[%s745_s2 + $0x40] sm:$0xff]  ;;  %545 = vmatprep.mubr.msk.f32.mxu1 %vm559_vm2, %v558_v34 }
   0x7   :  { %v30_v18 = vld [vmem:[%s744_s1 + $0x48] sm:$0xff]  ;;  %v31_v20 = vld [vmem:[%s744_s1 + $0x50] sm:$0xff]  ;;  %v45_v21 = vld [vmem:[%s745_s2 + $0x38] sm:$0xff] }
   0x8   :  { %493 = vmatmul.mubr.msk.f32.gmra.mxu0 %vm134_vm1, %v24_v5  ;;  %126 = vperm.xlu0 %551, %v52_v9   ;;  %v32_v22 = vld [vmem:[%s744_s1 + $0x58] sm:$0xff]  ;;  %v44_v23 = vld [vmem:[%s745_s2 + $0x30] sm:$0xff]  ;;  %v33_v24 = vld [vmem:[%s744_s1 + $0x60] sm:$0xff] }
   0x9   :  { %495 = vmatprep.mubr.msk.f32.mxu0 %vm134_vm1, %v25_v6  ;;  %116 = vperm.xlu1 %552, %v50_v11   ;;  %v43_v25 = vld [vmem:[%s745_s2 + $0x28] sm:$0xff]  ;;  %v42_v27 = vld [vmem:[%s745_s2 + $0x20] sm:$0xff]  ;;  %v35_v28 = vld [vmem:[%s744_s1 + $0x70] sm:$0xff] }
   0xa   :  { %v34_v26 = vld [vmem:[%s744_s1 + $0x68] sm:$0xff]  ;;  %v41_v29 = vld [vmem:[%s745_s2 + $0x18] sm:$0xff]  ;;  %v40_v31 = vld [vmem:[%s745_s2 + $0x10] sm:$0xff] }
   0xb   :  { %v36_v30 = vld [vmem:[%s744_s1 + $0x78] sm:$0xff]  ;;  %v39_v32 = vld [vmem:[%s745_s2 + $0x8] sm:$0xff]  ;;  %v38_v33 = vld [vmem:[%s745_s2] sm:$0xff] }
   0xc   :  { %496 = vmatmul.mubr.msk.f32.gmra.mxu0 %vm134_vm1, %v26_v10  ;;  %111 = vperm.xlu0 %551, %v49_v13  }
   0xd   :  { %498 = vmatprep.mubr.msk.f32.mxu0 %vm134_vm1, %v27_v12  ;;  %106 = vperm.xlu1 %552, %v48_v15  }
  0x10   :  { %499 = vmatmul.mubr.msk.f32.gmra.mxu0 %vm134_vm1, %v28_v14  ;;  %101 = vperm.xlu0 %551, %v47_v17  }
  0x11   :  { %501 = vmatprep.mubr.msk.f32.mxu0 %vm134_vm1, %v29_v16  ;;  %96 = vperm.xlu1 %552, %v46_v19  }
  0x14   :  { %502 = vmatmul.mubr.msk.f32.gmra.mxu0 %vm134_vm1, %v30_v18  ;;  %91 = vperm.xlu0 %551, %v45_v21  }
  0x15   :  { %504 = vmatprep.mubr.msk.f32.mxu0 %vm134_vm1, %v31_v20  ;;  %86 = vperm.xlu1 %552, %v44_v23  }
  0x18   :  { %505 = vmatmul.mubr.msk.f32.gmra.mxu0 %vm134_vm1, %v32_v22  ;;  %81 = vperm.xlu0 %551, %v43_v25  }
  0x19   :  { %507 = vmatprep.mubr.msk.f32.mxu0 %vm134_vm1, %v33_v24  ;;  %76 = vperm.xlu1 %552, %v42_v27  }
  0x1c   :  { %508 = vmatmul.mubr.msk.f32.gmra.mxu0 %vm134_vm1, %v34_v26  ;;  %71 = vperm.xlu0 %551, %v41_v29  }
  0x1d   :  { %510 = vmatprep.mubr.msk.f32.mxu0 %vm134_vm1, %v35_v28  ;;  %66 = vperm.xlu1 %552, %v40_v31  }
  0x20   :  { %511 = vmatmul.mubr.msk.f32.gmra.mxu0 %vm134_vm1, %v36_v30  ;;  %61 = vperm.xlu0 %551, %v39_v32  }
  0x21   :  { %56 = vperm.xlu1 %552, %v38_v33  }
  0x7f   :  { %v132_v40 = vpop.permute.xlu0 %131 }
  0x80   :  { %v122_v42 = vpop.permute.xlu1 %121 }
  0x83   :  { %v127_v45 = vpop.permute.xlu0 %126 }
  0x84   :  { %v117_v47 = vpop.permute.xlu1 %116 }
  0x87   :  { %v112_v50 = vpop.permute.xlu0 %111 }
  0x88   :  { %v107_v52 = vpop.permute.xlu1 %106 }
  0x8b   :  { %v102_v55 = vpop.permute.xlu0 %101 }
  0x8c   :  { %v97_v58 = vpop.permute.xlu1 %96 }
  0x8f   :  { %v92_v1 = vpop.permute.xlu0 %91 }
  0x90   :  { %v87_v4 = vpop.permute.xlu1 %86 }
  0x93   :  { %v82_v9 = vpop.permute.xlu0 %81 }
  0x94   :  { %v77_v12 = vpop.permute.xlu1 %76 }
  0x97   :  { %v72_v17 = vpop.permute.xlu0 %71 }
  0x98   :  { %v67_v20 = vpop.permute.xlu1 %66 }
  0x9b   :  { %v62_v25 = vpop.permute.xlu0 %61 }
  0x9c   :  { %v57_v28 = vpop.permute.xlu1 %56 }
  0xc4   :  { %v707_v35 = vpop.f32.mrf.mxu0 }
  0xc5   :  { %v259_v29 = vadd.f32 %v707_v35, %v62_v25  ;;  %v348_v35 = vld [vmem:[%s746_s3] sm:$0x1] }
  0xc6   :  { %v709_v36 = vpop.f32.mrf.mxu0 }
  0xc7   :  { %v254_v31 = vadd.f32 %v709_v36, %v57_v28  ;;  %v333_v33 = vmax.f32 %v259_v29, 0.0  ;;  %v350_v36 = vstv %s747_s4 }
  0xc8   :  { %v711_v37 = vpop.f32.mrf.mxu0 }
  0xc9   :  { %v269_v23 = vadd.f32 %v711_v37, %v72_v17  ;;  %v332_v37 = vmax.f32 %v254_v31, 0.0 }
  0xca   :  { %v713_v38 = vpop.f32.mrf.mxu0 }
  0xcb   :  { %v264_v26 = vadd.f32 %v713_v38, %v67_v20  ;;  %v335_v30 = vmax.f32 %v269_v23, 0.0 }
  0xcc   :  { %v497_v39 = vpop.f32.mrf.mxu0 }
  0xcd   :  { %v279_v18 = vadd.f32 %v497_v39, %v82_v9  ;;  %v334_v32 = vmax.f32 %v264_v26, 0.0 }
  0xce   :  { %v273_v41 = vpop.f32.mrf.mxu0 }
  0xcf   :  { %v274_v21 = vadd.f32 %v273_v41, %v77_v12  ;;  %v337_v24 = vmax.f32 %v279_v18, 0.0 }
  0xd0   :  { %v500_v43 = vpop.f32.mrf.mxu0 }
  0xd1   :  { %v289_v13 = vadd.f32 %v500_v43, %v92_v1  ;;  %v336_v27 = vmax.f32 %v274_v21, 0.0 }
  0xd2   :  { %v283_v44 = vpop.f32.mrf.mxu0 }
  0xd3   :  { %v284_v15 = vadd.f32 %v283_v44, %v87_v4  ;;  %v339_v19 = vmax.f32 %v289_v13, 0.0 }
  0xd4   :  { %v503_v46 = vpop.f32.mrf.mxu0 }
  0xd5   :  { %v299_v7 = vadd.f32 %v503_v46, %v102_v55  ;;  %v338_v22 = vmax.f32 %v284_v15, 0.0 }
  0xd6   :  { %v293_v48 = vpop.f32.mrf.mxu0 }
  0xd7   :  { %v294_v10 = vadd.f32 %v293_v48, %v97_v58  ;;  %v341_v14 = vmax.f32 %v299_v7, 0.0 }
  0xd8   :  { %v506_v49 = vpop.f32.mrf.mxu0 }
  0xd9   :  { %v309_v2 = vadd.f32 %v506_v49, %v112_v50  ;;  %v340_v16 = vmax.f32 %v294_v10, 0.0 }
  0xda   :  { %v303_v51 = vpop.f32.mrf.mxu0 }
  0xdb   :  { %v304_v5 = vadd.f32 %v303_v51, %v107_v52  ;;  %v343_v8 = vmax.f32 %v309_v2, 0.0 }
  0xdc   :  { %v509_v53 = vpop.f32.mrf.mxu0 }
  0xdd   :  { %v319_v60 = vadd.f32 %v509_v53, %v122_v42  ;;  %v342_v11 = vmax.f32 %v304_v5, 0.0 }
  0xde   :  { %v313_v54 = vpop.f32.mrf.mxu0 }
  0xdf   :  { %v314_v63 = vadd.f32 %v313_v54, %v117_v47  ;;  %v345_v3 = vmax.f32 %v319_v60, 0.0 }
  0xe0   :  { %v512_v56 = vpop.f32.mrf.mxu0 }
  0xe1   :  { %v329_v57 = vadd.f32 %v512_v56, %v132_v40  ;;  %v344_v6 = vmax.f32 %v314_v63, 0.0 }
  0xe2   :  { %v323_v59 = vpop.f32.mrf.mxu0 }
  0xe3   :  { %v347_v61 = vmax.f32 %v329_v57, 0.0  ;;  %v324_v62 = vadd.f32 %v323_v59, %v127_v45 }
  0xe5   :  { %v346_v0 = vmax.f32 %v324_v62, 0.0  ;;  %514 = vmatpush3.msra.mxu1 %v347_v61 }
  0xe6   :  { %515 = vmatprep.subr.mxu1 %v558_v34 }
  0xe7   :  { %516 = vmatpush3.msra.mxu1 %v346_v0 }
  0xe8   :  { %517 = vmatprep.subr.mxu1 %v558_v34 }
  0xe9   :  { %518 = vmatpush3.msra.mxu1 %v345_v3 }
  0xea   :  { %519 = vmatprep.subr.mxu1 %v558_v34 }
  0xeb   :  { %520 = vmatpush3.msra.mxu1 %v344_v6 }
  0xec   :  { %521 = vmatprep.subr.mxu1 %v558_v34 }
  0xed   :  { %522 = vmatpush3.msra.mxu1 %v343_v8 }
  0xee   :  { %523 = vmatprep.subr.mxu1 %v558_v34 }
  0xef   :  { %524 = vmatpush3.msra.mxu1 %v342_v11 }
  0xf0   :  { %525 = vmatprep.subr.mxu1 %v558_v34 }
  0xf1   :  { %526 = vmatpush3.msra.mxu1 %v341_v14 }
  0xf2   :  { %527 = vmatprep.subr.mxu1 %v558_v34 }
  0xf3   :  { %528 = vmatpush3.msra.mxu1 %v340_v16 }
  0xf4   :  { %529 = vmatprep.subr.mxu1 %v558_v34 }
  0xf5   :  { %530 = vmatpush3.msra.mxu1 %v339_v19 }
  0xf6   :  { %531 = vmatprep.subr.mxu1 %v558_v34 }
  0xf7   :  { %532 = vmatpush3.msra.mxu1 %v338_v22 }
  0xf8   :  { %533 = vmatprep.subr.mxu1 %v558_v34 }
  0xf9   :  { %534 = vmatpush3.msra.mxu1 %v337_v24 }
  0xfa   :  { %535 = vmatprep.subr.mxu1 %v558_v34 }
  0xfb   :  { %536 = vmatpush3.msra.mxu1 %v336_v27 }
  0xfc   :  { %537 = vmatprep.subr.mxu1 %v558_v34 }
  0xfd   :  { %538 = vmatpush3.msra.mxu1 %v335_v30 }
  0xfe   :  { %539 = vmatprep.subr.mxu1 %v558_v34 }
  0xff   :  { %540 = vmatpush3.msra.mxu1 %v334_v32 }
 0x100   :  { %541 = vmatprep.subr.mxu1 %v558_v34 }
 0x101   :  { %542 = vmatpush3.msra.mxu1 %v333_v33 }
 0x102   :  { %543 = vmatprep.subr.mxu1 %v558_v34 }
 0x103   :  { %544 = vmatpush3.msra.mxu1 %v332_v37 }
 0x104   :  { %546 = vmatmul.mubr.f32.vlgmr.msra.gmra.mxu1 %v348_v35 }
 0x1c4   :  { %v417_v38 = vpop.f32.mrf.mxu1 }
 0x1c5   :  { %v418_v39 = vadd.f32 %v417_v38, %v350_v36 }
 0x1c6   :  { %v547_v40 = vpop.f32.mrf.mxu1 }
 0x1c7   :  { %v421_v41 = vand.u32 2147483647, %v418_v39  ;;  %vm428_vm3 = vcmp.ge.f32.partialorder %v418_v39, 0.0 }
 0x1c9   :  { %v422_v42 = vsub.f32 0.0, %v421_v41 }
 0x1cb   :  { %v423_v43 = vmul.f32 1.442695, %v422_v42 }
 0x1cd   :  { %553 = vpow2.f32 %v423_v43 }
 0x1da   :  { %v554_v44 = vpop.eup %553 }
 0x1db   :  { %v425_v45 = vadd.f32 1.0, %v554_v44 }
 0x1dd   :  { %555 = vrcp.f32 %v425_v45 }
 0x1ea   :  { %v556_v46 = vpop.eup %555 }
 0x1eb   :  { %v429_v47 = vmul.f32 %v556_v46, %v554_v44 }
 0x1ed   :  { %v430_v34 = vsel %vm428_vm3, %v556_v46, %v429_v47 }
 0x1ee   :  { %431 = vst [vmem:[%s748_s5] sm:$0x1] %v430_v34 }

</bundles_post_ra>
